<compile_context>
chip_gen: v7x
topology: tpu7x:2x2x1
jax: 0.10.0
libtpu: 0.0.40
codegen_flags: <defaults>
</compile_context>

<pallas_src>
import jax
import jax.numpy as jnp
from jax.experimental import pallas as pl
from jax.experimental.pallas import tpu as pltpu

PAD_INDEX = 0
_NEG_FILL = -1e30  # finite "minus infinity": exp(fill - max) underflows to 0


def _sentence_ce_kernel(logits_ref, trg_ref, nll_ref, m_ref, l_ref, t_ref):
    """Grid = (token_tiles, vocab_tiles). Per-token online logsumexp."""
    k = pl.program_id(1)
    nk = pl.num_programs(1)

    @pl.when(k == 0)
    def _():
        m_ref[...] = jnp.full_like(m_ref, -jnp.inf)
        l_ref[...] = jnp.zeros_like(l_ref)
        t_ref[...] = jnp.zeros_like(t_ref)

    x = logits_ref[...]                                 # native dtype (bf16 stays bf16)
    trg = trg_ref[...]                                  # (TOK_TILE, 1) int32
    v_tile = x.shape[1]

    # --- online logsumexp over the vocab axis ---
    # max in the native dtype (exact), only the exp operand is promoted to f32.
    m_prev = m_ref[...]                                 # (TOK_TILE, 1) f32
    m_new = jnp.maximum(m_prev,
                        jnp.max(x, axis=-1, keepdims=True).astype(jnp.float32))
    p = jnp.exp(x.astype(jnp.float32) - m_new)          # EUP, f32
    l_ref[...] = (l_ref[...] * jnp.exp(m_prev - m_new)
                  + jnp.sum(p, axis=-1, keepdims=True))
    m_ref[...] = m_new

    # --- target logit: native-dtype fused select, local iota, no offset add ---
    col = jax.lax.broadcasted_iota(jnp.int32, x.shape, 1)       # local lane index
    trg_local = trg - k * v_tile                                 # (TOK_TILE, 1)
    sel = jnp.where(col == trg_local, x, 0)                      # <=1 nonzero/row -> exact
    t_ref[...] += jnp.sum(sel, axis=-1, keepdims=True).astype(jnp.float32)

    @pl.when(k == nk - 1)
    def _():
        nll = m_ref[...] + jnp.log(l_ref[...]) - t_ref[...]      # (TOK_TILE, 1)
        # masked_fill(trg == PAD, 0) done here so the wrapper only sums.
        nll_ref[...] = jnp.where(trg != PAD_INDEX, nll, 0.0)


def _vmem_capacity_bytes():
    try:
        return int(pltpu.get_tpu_info().vmem_capacity_bytes)
    except Exception:
        return 128 << 20  # conservative assumption (v5e/v6e)


def _pick_tok_tile(n_tokens):
    """Default 512, but keep >= 2 token tiles so the 'parallel' axis can shard
    across TensorCores (v7x megacore). Always a multiple of 8."""
    tok_tile = 512
    while tok_tile > 8 and pl.cdiv(n_tokens, tok_tile) < 2:
        tok_tile //= 2
    return tok_tile


def _pick_vocab_tile(v, preferred):
    """Return (v_tile, padded_V). Prefer a multiple-of-128 divisor of V
    (no padding); otherwise pad V up to a multiple of a 128-multiple tile."""
    t = min((preferred // 128) * 128, (v // 128) * 128)
    while t >= 128:
        if v % t == 0:
            return t, v
        t -= 128
    v_tile = max(min((preferred // 128) * 128, pl.cdiv(v, 128) * 128), 128)
    return v_tile, pl.cdiv(v, v_tile) * v_tile


def sentence_cross_entropy(logits, trg, *, tok_tile=None, v_tile=None):
    """logits: (B, T, V) float (f32 or bf16); trg: (B, T) int. Scalar f32 loss."""
    B, T, V = logits.shape
    n = B * T
    itemsize = jnp.dtype(logits.dtype).itemsize
    vmem_cap = _vmem_capacity_bytes()

    if tok_tile is None:
        tok_tile = _pick_tok_tile(n)
    assert tok_tile % 8 == 0, "token tile must be a multiple of 8 (sublanes)"

    if v_tile is None:
        # ~4 MiB logits blocks on 64 MiB-VMEM chips (v7x), ~8 MiB otherwise.
        target_block = (4 << 20) if vmem_cap <= (64 << 20) else (8 << 20)
        preferred = max((target_block // (tok_tile * itemsize)) // 128 * 128, 128)
        v_tile, v_pad = _pick_vocab_tile(V, preferred)
    else:
        assert v_tile % 128 == 0 or v_tile == V, "bad vocab tile"
        v_pad = pl.cdiv(V, v_tile) * v_tile

    n_pad = pl.cdiv(n, tok_tile) * tok_tile

    logits2 = logits.reshape(n, V)
    trg2 = trg.reshape(n, 1).astype(jnp.int32)
    if n_pad != n or v_pad != V:
        # Padded rows/columns use a large negative fill: exp underflows to 0,
        # padded columns are never selected (targets < V), padded rows have
        # PAD targets so their NLL is zeroed in the kernel.
        logits2 = jnp.pad(logits2, ((0, n_pad - n), (0, v_pad - V)),
                          constant_values=_NEG_FILL)
        trg2 = jnp.pad(trg2, ((0, n_pad - n), (0, 0)), constant_values=PAD_INDEX)

    grid = (n_pad // tok_tile, v_pad // v_tile)

    # VMEM budget: double-buffered logits block + f32 temporaries (exp operand
    # and p) + slack, capped well below physical capacity.
    block_bytes = tok_tile * v_tile * itemsize
    needed = 2 * block_bytes + 2 * tok_tile * v_tile * 4 + (1 << 20)
    vmem_limit = int(min(max(needed, 32 << 20), vmem_cap * 3 // 4))

    cost = pl.CostEstimate(
        flops=6 * n_pad * v_pad,
        transcendentals=n_pad * v_pad,
        bytes_accessed=n_pad * v_pad * itemsize + n_pad * 4 + n_pad * 4,
    )

    nll = pl.pallas_call(
        _sentence_ce_kernel,
        out_shape=jax.ShapeDtypeStruct((n_pad, 1), jnp.float32),
        grid_spec=pltpu.PrefetchScalarGridSpec(
            num_scalar_prefetch=0,
            grid=grid,
            in_specs=[
                pl.BlockSpec((tok_tile, v_tile), lambda i, k: (i, k)),
                pl.BlockSpec((tok_tile, 1), lambda i, k: (i, 0)),
            ],
            out_specs=pl.BlockSpec((tok_tile, 1), lambda i, k: (i, 0)),
            scratch_shapes=[
                pltpu.VMEM((tok_tile, 1), jnp.float32),   # running max m
                pltpu.VMEM((tok_tile, 1), jnp.float32),   # running sum-exp l
                pltpu.VMEM((tok_tile, 1), jnp.float32),   # running target logit
            ],
        ),
        compiler_params=pltpu.CompilerParams(
            dimension_semantics=("parallel", "arbitrary"),
            vmem_limit_bytes=vmem_limit,
        ),
        cost_estimate=cost,
    )(logits2, trg2)

    # Tiny (B, T)-level finalization in plain JAX (negligible vs. the V-stream).
    nll_bt = nll[:n, 0].reshape(B, T)
    mask = trg != PAD_INDEX
    lens = jnp.sum(mask, axis=1).astype(jnp.float32)
    # TODO(synk): an all-PAD sentence gives 0/0 = NaN, matching the PyTorch module.
    return jnp.mean(jnp.sum(nll_bt, axis=1) / lens)


def _reference(logits, trg):
    # Pure-JAX reference mirroring the PyTorch module.
    logits = logits.astype(jnp.float32)
    lse = jax.scipy.special.logsumexp(logits, axis=-1)
    tgt = jnp.take_along_axis(logits, trg[..., None], axis=-1)[..., 0]
    nll = lse - tgt
    mask = trg != PAD_INDEX
    nll = jnp.where(mask, nll, 0.0)
    lens = jnp.sum(mask, axis=1).astype(jnp.float32)
    return jnp.mean(jnp.sum(nll, axis=1) / lens)


if __name__ == "__main__":
    B, T, V = 2, 8, 512  # small shapes; explicit tiles below force a real 2-D grid

    key = jax.random.PRNGKey(0)
    k_logits, k_trg = jax.random.split(key)

    logits = jax.random.normal(k_logits, (B, T, V), dtype=jnp.float32)
    # Targets in [1, V); pad the tail of the second sentence with PAD_INDEX.
    trg = jax.random.randint(k_trg, (B, T), 1, V, dtype=jnp.int32)
    pad_mask = jnp.arange(T)[None, :] >= jnp.array([T, T - 3])[:, None]
    trg = jnp.where(pad_mask, PAD_INDEX, trg)

    ref = _reference(logits, trg)

    # f32 path; explicit small tiles exercise the (2 token-tile, 4 vocab-tile) grid.
    loss = sentence_cross_entropy(logits, trg, tok_tile=8, v_tile=128)
    jax.block_until_ready(loss)
    assert jnp.allclose(loss, ref, atol=1e-5, rtol=1e-5), (loss, ref)

    # Auto tile-selection path (generation-aware defaults).
    loss_auto = sentence_cross_entropy(logits, trg)
    jax.block_until_ready(loss_auto)
    assert jnp.allclose(loss_auto, ref, atol=1e-5, rtol=1e-5), (loss_auto, ref)

    # bf16 path (halves HBM bytes; max/select stay bf16, only exp operand is f32).
    logits_bf16 = logits.astype(jnp.bfloat16)
    loss_bf16 = sentence_cross_entropy(logits_bf16, trg, tok_tile=8, v_tile=128)
    jax.block_until_ready(loss_bf16)
    ref_bf16 = _reference(logits_bf16, trg)
    assert jnp.allclose(loss_bf16, ref_bf16, atol=2e-4, rtol=2e-4), (loss_bf16, ref_bf16)

    print("KERNEL_OK")
</pallas_src>

<mosaic_0001>
module attributes {stable_mosaic.version = 11 : i64} {
  func.func @_sentence_ce_kernel(%arg0: i32, %arg1: i32, %arg2: memref<8x128xf32, #tpu.memory_space<vmem>>, %arg3: memref<8x1xi32, #tpu.memory_space<vmem>>, %arg4: memref<8x1xf32, #tpu.memory_space<vmem>>, %arg5: memref<8x1xf32, #tpu.memory_space<vmem>>, %arg6: memref<8x1xf32, #tpu.memory_space<vmem>>, %arg7: memref<8x1xf32, #tpu.memory_space<vmem>>) attributes {dimension_semantics = [#tpu.dimension_semantics<parallel>, #tpu.dimension_semantics<arbitrary>], iteration_bounds = array<i64: 2, 4>, scalar_prefetch = 0 : i64, scratch_operands = 3 : i64, tpu.core_type = #tpu.core_type<tc>, window_params = [{transform_indices = @transform_0, window_bounds = array<i64: 8, 128>}, {transform_indices = @transform_1, window_bounds = array<i64: 8, 1>}, {transform_indices = @transform_2, window_bounds = array<i64: 8, 1>}]} {
    %c0_i32 = arith.constant 0 : i32
    %0 = arith.cmpi eq, %arg1, %c0_i32 : i32
    %1 = arith.extui %0 : i1 to i32
    %c0_i32_0 = arith.constant 0 : i32
    %2 = arith.cmpi ne, %1, %c0_i32_0 : i32
    scf.if %2 {
      %cst_20 = arith.constant 0xFF800000 : f32
      %38 = vector.broadcast %cst_20 : f32 to vector<8x1xf32>
      %c0_21 = arith.constant 0 : index
      %c0_22 = arith.constant 0 : index
      %39 = vector.load %arg5[%c0_21, %c0_22] : memref<8x1xf32, #tpu.memory_space<vmem>>, vector<8x1xf32>
      tpu.vector_store %arg5[%c0_21, %c0_22], %38 {strides = array<i32>} : memref<8x1xf32, #tpu.memory_space<vmem>>, vector<8x1xf32>,
      %cst_23 = arith.constant 0.000000e+00 : f32
      %40 = vector.broadcast %cst_23 : f32 to vector<8x1xf32>
      %c0_24 = arith.constant 0 : index
      %c0_25 = arith.constant 0 : index
      %41 = vector.load %arg6[%c0_24, %c0_25] : memref<8x1xf32, #tpu.memory_space<vmem>>, vector<8x1xf32>
      tpu.vector_store %arg6[%c0_24, %c0_25], %40 {strides = array<i32>} : memref<8x1xf32, #tpu.memory_space<vmem>>, vector<8x1xf32>,
      %cst_26 = arith.constant 0.000000e+00 : f32
      %42 = vector.broadcast %cst_26 : f32 to vector<8x1xf32>
      %c0_27 = arith.constant 0 : index
      %c0_28 = arith.constant 0 : index
      %43 = vector.load %arg7[%c0_27, %c0_28] : memref<8x1xf32, #tpu.memory_space<vmem>>, vector<8x1xf32>
      tpu.vector_store %arg7[%c0_27, %c0_28], %42 {strides = array<i32>} : memref<8x1xf32, #tpu.memory_space<vmem>>, vector<8x1xf32>,
    } else {
    }
    %c0 = arith.constant 0 : index
    %c0_1 = arith.constant 0 : index
    %3 = vector.load %arg2[%c0, %c0_1] : memref<8x128xf32, #tpu.memory_space<vmem>>, vector<8x128xf32>
    %c0_2 = arith.constant 0 : index
    %c0_3 = arith.constant 0 : index
    %4 = vector.load %arg3[%c0_2, %c0_3] : memref<8x1xi32, #tpu.memory_space<vmem>>, vector<8x1xi32>
    %c0_4 = arith.constant 0 : index
    %c0_5 = arith.constant 0 : index
    %5 = vector.load %arg5[%c0_4, %c0_5] : memref<8x1xf32, #tpu.memory_space<vmem>>, vector<8x1xf32>
    %cst = arith.constant dense<0xFF800000> : vector<8xf32>
    %6 = vector.multi_reduction <maximumf>, %3, %cst [1] : vector<8x128xf32> to vector<8xf32>
    %7 = vector.shape_cast %6 : vector<8xf32> to vector<8x1xf32>
    %8 = arith.maximumf %5, %7 : vector<8x1xf32>
    %9 = vector.broadcast %8 : vector<8x1xf32> to vector<8x128xf32>
    %10 = arith.subf %3, %9 : vector<8x128xf32>
    %11 = math.exp %10 : vector<8x128xf32>
    %c0_6 = arith.constant 0 : index
    %c0_7 = arith.constant 0 : index
    %12 = vector.load %arg6[%c0_6, %c0_7] : memref<8x1xf32, #tpu.memory_space<vmem>>, vector<8x1xf32>
    %13 = arith.subf %5, %8 : vector<8x1xf32>
    %14 = math.exp %13 : vector<8x1xf32>
    %15 = arith.mulf %12, %14 : vector<8x1xf32>
    %cst_8 = arith.constant dense<0.000000e+00> : vector<8xf32>
    %16 = vector.multi_reduction <add>, %11, %cst_8 [1] : vector<8x128xf32> to vector<8xf32>
    %17 = vector.shape_cast %16 : vector<8xf32> to vector<8x1xf32>
    %18 = arith.addf %15, %17 : vector<8x1xf32>
    %c0_9 = arith.constant 0 : index
    %c0_10 = arith.constant 0 : index
    %19 = vector.load %arg6[%c0_9, %c0_10] : memref<8x1xf32, #tpu.memory_space<vmem>>, vector<8x1xf32>
    tpu.vector_store %arg6[%c0_9, %c0_10], %18 {strides = array<i32>} : memref<8x1xf32, #tpu.memory_space<vmem>>, vector<8x1xf32>,
    %c0_11 = arith.constant 0 : index
    %c0_12 = arith.constant 0 : index
    %20 = vector.load %arg5[%c0_11, %c0_12] : memref<8x1xf32, #tpu.memory_space<vmem>>, vector<8x1xf32>
    tpu.vector_store %arg5[%c0_11, %c0_12], %8 {strides = array<i32>} : memref<8x1xf32, #tpu.memory_space<vmem>>, vector<8x1xf32>,
    %21 = tpu.iota {dimensions = array<i32: 1>} : vector<8x128xi32>
    %c128_i32 = arith.constant 128 : i32
    %22 = arith.muli %arg1, %c128_i32 : i32
    %23 = vector.broadcast %22 : i32 to vector<8x1xi32>
    %24 = arith.subi %4, %23 : vector<8x1xi32>
    %25 = vector.broadcast %24 : vector<8x1xi32> to vector<8x128xi32>
    %26 = arith.cmpi eq, %21, %25 : vector<8x128xi32>
    %c0_i32_13 = arith.constant 0 : i32
    %27 = arith.sitofp %c0_i32_13 : i32 to f32
    %28 = vector.broadcast %27 : f32 to vector<8x128xf32>
    %29 = arith.select %26, %3, %28 : vector<8x128xi1>, vector<8x128xf32>
    %c0_14 = arith.constant 0 : index
    %c0_15 = arith.constant 0 : index
    %30 = vector.load %arg7[%c0_14, %c0_15] : memref<8x1xf32, #tpu.memory_space<vmem>>, vector<8x1xf32>
    %cst_16 = arith.constant dense<0.000000e+00> : vector<8xf32>
    %31 = vector.multi_reduction <add>, %29, %cst_16 [1] : vector<8x128xf32> to vector<8xf32>
    %32 = vector.shape_cast %31 : vector<8xf32> to vector<8x1xf32>
    %33 = arith.addf %30, %32 : vector<8x1xf32>
    %c0_17 = arith.constant 0 : index
    %c0_18 = arith.constant 0 : index
    %34 = vector.load %arg7[%c0_17, %c0_18] : memref<8x1xf32, #tpu.memory_space<vmem>>, vector<8x1xf32>
    tpu.vector_store %arg7[%c0_17, %c0_18], %33 {strides = array<i32>} : memref<8x1xf32, #tpu.memory_space<vmem>>, vector<8x1xf32>,
    %c3_i32 = arith.constant 3 : i32
    %35 = arith.cmpi eq, %arg1, %c3_i32 : i32
    %36 = arith.extui %35 : i1 to i32
    %c0_i32_19 = arith.constant 0 : i32
    %37 = arith.cmpi ne, %36, %c0_i32_19 : i32
    scf.if %37 {
      %c0_20 = arith.constant 0 : index
      %c0_21 = arith.constant 0 : index
      %38 = vector.load %arg5[%c0_20, %c0_21] : memref<8x1xf32, #tpu.memory_space<vmem>>, vector<8x1xf32>
      %c0_22 = arith.constant 0 : index
      %c0_23 = arith.constant 0 : index
      %39 = vector.load %arg6[%c0_22, %c0_23] : memref<8x1xf32, #tpu.memory_space<vmem>>, vector<8x1xf32>
      %40 = math.log %39 : vector<8x1xf32>
      %41 = arith.addf %38, %40 : vector<8x1xf32>
      %c0_24 = arith.constant 0 : index
      %c0_25 = arith.constant 0 : index
      %42 = vector.load %arg7[%c0_24, %c0_25] : memref<8x1xf32, #tpu.memory_space<vmem>>, vector<8x1xf32>
      %43 = arith.subf %41, %42 : vector<8x1xf32>
      %c0_i32_26 = arith.constant 0 : i32
      %44 = vector.broadcast %c0_i32_26 : i32 to vector<8x1xi32>
      %45 = arith.cmpi ne, %4, %44 : vector<8x1xi32>
      %cst_27 = arith.constant 0.000000e+00 : f32
      %46 = vector.broadcast %cst_27 : f32 to vector<8x1xf32>
      %47 = arith.select %45, %43, %46 : vector<8x1xi1>, vector<8x1xf32>
      %c0_28 = arith.constant 0 : index
      %c0_29 = arith.constant 0 : index
      %48 = vector.load %arg4[%c0_28, %c0_29] : memref<8x1xf32, #tpu.memory_space<vmem>>, vector<8x1xf32>
      tpu.vector_store %arg4[%c0_28, %c0_29], %47 {strides = array<i32>} : memref<8x1xf32, #tpu.memory_space<vmem>>, vector<8x1xf32>,
    } else {
    }
    return
  }
  func.func @transform_0(%arg0: i32, %arg1: i32) -> (i32, i32) {
    %c0_i32 = arith.constant 0 : i32
    return %arg0, %arg1 : i32, i32
  }
  func.func @transform_1(%arg0: i32, %arg1: i32) -> (i32, i32) {
    %c0_i32 = arith.constant 0 : i32
    %c0_i32_0 = arith.constant 0 : i32
    return %arg0, %c0_i32 : i32, i32
  }
  func.func @transform_2(%arg0: i32, %arg1: i32) -> (i32, i32) {
    %c0_i32 = arith.constant 0 : i32
    %c0_i32_0 = arith.constant 0 : i32
    return %arg0, %c0_i32 : i32, i32
  }
}

</mosaic_0001>

<bundles_post_ra>
// kernel: tpu_custom_call.1
= control target key start
LH: loop header
LB: loop body
LE: loop exit
PB: predicated region body
PF: predicated region fallthrough
CT: control target
= control target key end

     0   :  { %7 = vsyncpa [#allocation6], 0  ;;  %s722_s0 = inlined_call_operand.hbm [shape: f32[16,512], index: 0, kind: input, shape index: {}]   ;;  %s723_s1 = inlined_call_operand.vmem [shape: s32[16,1], index: 1, kind: input, shape index: {}]   ;;  %s724_s2 = inlined_call_operand.vmem [shape: f32[16,1], index: 2, kind: output, shape index: {}]  }
   0x1   :  { %9 = vsyncpa [#allocation6 + $0x1], 0  ;;  %s559_s9 = smov 0   ;;  %s561_s10 = smov 0  }
   0x2   :  { %s563_s11 = smov 0   ;;  %s565_s12 = smov 0  }
   0x3   :  { %s567_s13 = smov 0   ;;  %s569_s14 = smov 0  }
   0x4   :  { %s571_s15 = smov 0   ;;  %s573_s16 = smov 0  }
   0x5 LB: > { %s344_s17 = sadd.s32 4294967295, %s538_s16   ;;  %s24_s18 = sadd.s32 1, %s530_s14  ;;  %s538_s16 = sphi %s573_s16, %s15_s16   ;;  %s534_s15 = sphi %s571_s15, %s736_s15   ;;  %s530_s14 = sphi %s569_s14, %s735_s14   ;;  %s526_s13 = sphi %s567_s13, %s734_s13   ;;  %s522_s12 = sphi %s565_s12, %s733_s12   ;;  %s518_s11 = sphi %s563_s11, %s732_s11   ;;  %s514_s10 = sphi %s561_s10, %s731_s10   ;;  %s510_s9 = sphi %s559_s9, %s730_s9  }
   0x6   : > { %p25_p0 = scmp.ge.s32.totalorder %s24_s18, 4  ;;  %s27_s19 = sadd.s32 1, %s534_s15 }
   0x7   : > { %s36_s20 = sadd.s32 1, %s518_s11  ;;  %p43_p1 = scmp.ne.s32.totalorder %s518_s11, %s514_s10 }
   0x8   : > { %s738_s18 = smov (%p25_p0, %s24_s18), 0  ;;  %s740_s19 = smov (!%p25_p0, %s27_s19), %s534_s15 }
   0x9   : > { %s32_s21 = ssub.s32 %s530_s14, %s738_s18  ;;  %p44_p2 = scmp.eq.s32.totalorder %s538_s16, 0 }
   0xa   : > { %p29_p3 = scmp.ge.s32.totalorder %s740_s19, 2  ;;  %p49_p4 = scmp.ne.s32.totalorder %s514_s10, %s510_s9 }
   0xb   : > { %p610_p5 = por %p44_p2, %p43_p1  ;;  %p50_p6 = scmp.eq.s32.totalorder %s344_s17, 0 }
   0xc   : > { %s742_s19 = smov (%p29_p3, %s740_s19), 0  ;;  %p366_p8 = scmp.lt.s32.totalorder %s538_s16, 8 }
   0xd   : > { %p616_p7 = por %p50_p6, %p49_p4  ;;  %s31_s24 = ssub.s32 %s534_s15, %s742_s19 }
   0xe   : > { %s33_s25 = sor.u32 %s32_s21, %s31_s24  ;;  %s125_s26 = sand.u32 1, %s518_s11  }
   0xf   : > { %p34_p9 = scmp.eq.s32.totalorder %s33_s25, 0  ;;  %s348_s27 = sshll.u32 %s125_s26, 3 }
  0x10   : > { %s349_s28 = sshll.u32 %s534_s15, 2  ;;  %s129_s4 = scalar_lea.vmem [#allocation5], %s348_s27 }
  0x11   : > { %s626_s29 = scalar_select %p34_p9, %s518_s11, %s36_s20  }
  0x12   : > { %s134_s30 = sadd.s32 %s530_s14, %s349_s28  ;;  %s138_s5 = sshll.u32 %s129_s4, 4  ;;  %s634_s5 = int_to_ptr.vmem [resolvable:$true] %s138_s5 }
  0x13   : > { %s350_s3 = sshll.u32 %s134_s30, 7  ;;  %p640_p10 = pnand %p366_p8, %p610_p5 }
  0x14   : > { %s632_s8 = scalar_lea.hbm %s722_s0, %s350_s3  ;;  %s126_s17 = scalar_lea.sflag [#allocation6], %s125_s26 }
  0x15   : > { %s442_s20 = scalar_lea.hbm %s632_s8, 128  ;;  %p444_p0 = pneg %p640_p10 }
  0x16   : > { %p443_p13 = scmp.ne.s32.totalorder %s632_s8, %s442_s20  ;;  %s447_s24 = scalar_lea.hbm %s722_s0, 1024 }
  0x17   : > { %p448_p3 = scmp.lt.u32.totalorder %s632_s8, %s722_s0  ;;  %p449_p4 = scmp.lt.u32.totalorder %s447_s24, %s442_s20 }
  0x18   : > { %p445_p1 = pnand %p444_p0, %p443_p13  ;;  %p451_p6 = scmp.lt.u32.totalorder %s442_s20, %s632_s8 }
  0x19   : > { %p450_p5 = por %p449_p4, %p448_p3 }
  0x1a   : > { %p446_p2 = pneg %p445_p1 }
  0x1b   : > { %p452_p8 = por %p451_p6, %p450_p5 }
  0x1d   : > { %p453_p9 = pnand %p452_p8, %p446_p2 }
  0x1f   : > { %456 = shalt.err (!%p453_p9)
}
  0x20   : > { %s457_s26 = scalar_lea.vmem %s634_s5, 128  ;;  %s540_s28 = smov [#allocation5]  }
  0x21   : > { %p458_p13 = scmp.ne.s32.totalorder %s634_s5, %s457_s26  ;;  %s462_s30 = sshll.u32 %s540_s28, 4  ;;  %s463_s30 = int_to_ptr.vmem [resolvable:$false] %s462_s30 }
  0x22   : > { %s464_s3 = scalar_lea.vmem %s463_s30, 256  ;;  %p465_p12 = scmp.lt.s32.totalorder %s634_s5, %s463_s30 }
  0x23   : > { %p460_p1 = pnand %p458_p13, %p444_p0  ;;  %p466_p3 = scmp.lt.s32.totalorder %s464_s3, %s457_s26 }
  0x25   : > { %p461_p11 = pneg %p460_p1  ;;  %p467_p4 = por %p466_p3, %p465_p12 }
  0x27   : > { %p468_p5 = pnand %p467_p4, %p461_p11 }
  0x29   : > { %471 = shalt.err (!%p468_p5)
}
  0x2a   : > { %365 = dma.hbm_to_vmem [thread:$0]  (!%p640_p10), %s632_s8, 128, %s634_s5, %s126_s17  }
  0x2b   : > { %p728_p2 = scmp.lt.s32.totalorder %s538_s16, 9  ;;  %p729_p6 = scmp.ge.s32.totalorder %s538_s16, 1 }
  0x2d   : > { %p151_p0 = pnand %p729_p6, %p728_p2 }
  0x2e   : > { %s156_s4 = sand.u32 (!%p151_p0), 1, %s514_s10  }
  0x2f   : > { %154 = sbr.rel (%p151_p0) target bundleno = 523 (0x20b), region = 28  ;;  %s352_s6 = sshll.u32 (!%p151_p0), %s156_s4, 3 }
  0x30   : > { %s157_s7 = scalar_lea.sflag (!%p151_p0), [#allocation6], %s156_s4  ;;  %s160_s20 = scalar_lea.vmem (!%p151_p0), [#allocation5], %s352_s6 }
  0x36   : > { %505 = dma.done.wait (%p616_p7), %s157_s7, 128  }
  0x37   : > { %507 = vsyncadd (%p616_p7), %s157_s7, 4294967168  ;;  %p184_p11 = scmp.lt.s32.totalorder %s526_s13, 1  ;;  %p355_p10 = scmp.ne.s32.totalorder %s522_s12, 0 }
  0x38   : > { %vm196_vm0 = vcmask (!%p355_p10), 7168   ;;  %v541_v0 = vmov (!%p355_p10), -inf   ;;  %v542_v1 = vmov (!%p355_p10), 0.0  }
  0x39   : > { %s744_s13 = smov (!%p184_p11, %s526_s13), 1  ;;  %195 = sbr.rel (%p355_p10) target bundleno = 64 (0x40), region = 36 }
  0x3a   : > { %s353_s5 = sshll.u32 %s744_s13, 3  ;;  %197 = vst.msk [vmem:[#allocation2] sm:$0xff] (!%p355_p10), %vm196_vm0, %v541_v0  ;;  %198 = vst.msk [vmem:[#allocation3] sm:$0xff] (!%p355_p10), %vm196_vm0, %v542_v1 }
  0x3b   : > { %s187_s17 = scalar_lea.vmem %s723_s1, %s353_s5  ;;  %s688_s24 = scalar_lea.vmem %s724_s2, %s353_s5  ;;  %199 = vst.msk [vmem:[#allocation4] sm:$0xff] (!%p355_p10), %vm196_vm0, %v542_v1 }
  0x40 PF: > { %v200_v2 = vld [vmem:[%s160_s20] sm:$0xff]  ;;  %v543_v3 = vmov 0   ;;  %s356_s13 = sshll.u32 %s522_s12, 7  ;;  %vm222_vm1 = vcmask 7168   ;;  %v225_v14 = vlaneseq  ;;  %p357_p7 = scmp.ne.s32.totalorder %s522_s12, 3 }
  0x41   : > { %203 = vmax.xlane.f32.xlu0 %v200_v2  ;;  %435 = vset.pattern.permute.xlu1 %v543_v3  ;;  %v201_v4 = vld [vmem:[%s187_s17] sm:$0xff]  ;;  %v228_v5 = vstv %s356_s13  ;;  %v214_v21 = vld [vmem:[#allocation3] sm:$0xff] }
  0x42   : > { %434 = vset.pattern.permute.xlu0 %v543_v3  ;;  %v229_v6 = vsub.s32 %v201_v4, %v228_v5  ;;  %v202_v7 = vld [vmem:[#allocation2] sm:$0xff]  ;;  %v226_v15 = vand.u32 127, %v225_v14  ;;  %v235_v25 = vld [vmem:[#allocation4] sm:$0xff]  ;;  %vm251_vm3 = vcmp.ne.s32.totalorder (!%p357_p7), %v201_v4, 0 }
  0x44   : > { %231 = vperm.xlu1 %435, %v229_v6  }
  0xc3   : > { %v232_v16 = vpop.permute.xlu1 %231 }
  0xc4   : > { %vm233_vm2 = vcmp.eq.s32.totalorder %v226_v15, %v232_v16 }
  0xc5   : > { %v234_v18 = vsel %vm233_vm2, %v200_v2, 0.0 }
  0xce   : > { %v204_v8 = vpop.xlane.xlu0 %203 }
  0xcf   : > { %v205_v9 = vmax.f32 %v202_v7, %v204_v8 }
  0xd1   : > { %v215_v10 = vsub.f32 %v202_v7, %v205_v9  ;;  %224 = vst.msk [vmem:[#allocation2] sm:$0xff] %vm222_vm1, %v205_v9  ;;  %208 = vperm.xlu0 %434, %v205_v9  }
  0xd3   : > { %v216_v19 = vmul.f32 1.442695, %v215_v10 }
  0xd8   : > { %v244_v30 = vld [vmem:[#allocation2] sm:$0xff] (!%p357_p7) }
 0x150   : > { %v209_v11 = vpop.permute.xlu0 %208 }
 0x151   : > { %v211_v12 = vsub.f32 %v200_v2, %v209_v11 }
 0x153   : > { %v212_v13 = vmul.f32 1.442695, %v211_v12 }
 0x155   : > { %436 = vpow2.f32 %v212_v13 }
 0x156   : > { %438 = vpow2.f32 %v216_v19 }
 0x15f   : > { %v437_v17 = vpop.eup %436 }
 0x160   : > { %219 = vadd.xlane.f32.xlu1 %v437_v17  ;;  %v439_v20 = vpop.eup %438 }
 0x161   : > { %v218_v22 = vmul.f32 %v439_v20, %v214_v21 }
 0x164   : > { %236 = vadd.xlane.f32.xlu1 %v234_v18 }
 0x1ed   : > { %v220_v23 = vpop.xlane.xlu1 %219 }
 0x1ee   : > { %v221_v24 = vadd.f32 %v220_v23, %v218_v22  ;;  %243 = sbr.rel (%p357_p7) target bundleno = 523 (0x20b), region = 40 }
 0x1f0   : > { %223 = vst.msk [vmem:[#allocation3] sm:$0xff] %vm222_vm1, %v221_v24 }
 0x1f1   : > { %v237_v26 = vpop.xlane.xlu1 %236 }
 0x1f2   : > { %v238_v27 = vadd.f32 %v237_v26, %v235_v25 }
 0x1f4   : > { %239 = vst.msk [vmem:[#allocation4] sm:$0xff] %vm222_vm1, %v238_v27 }
 0x1f7   : > { %v245_v28 = vld [vmem:[#allocation3] sm:$0xff] }
 0x1f8   : > { %440 = vlog2.f32 %v245_v28 }
 0x1fb   : > { %v249_v32 = vld [vmem:[#allocation4] sm:$0xff] }
 0x202   : > { %v441_v29 = vpop.eup %440 }
 0x203   : > { %v247_v31 = vmul.f32 0.6931472, %v441_v29 }
 0x205   : > { %v248_v33 = vadd.f32 %v247_v31, %v244_v30 }
 0x207   : > { %v250_v34 = vsub.f32 %v248_v33, %v249_v32 }
 0x209   : > { %v252_v35 = vsel %vm251_vm3, %v250_v34, 0.0 }
 0x20a   : > { %253 = vst.msk [vmem:[%s688_s24] sm:$0xff] %vm222_vm1, %v252_v35 }
 0x20b PF: > { %s15_s16 = sadd.s32 1, %s538_s16   ;;  %s730_s9 = smov %s514_s10 }
 0x20c   : > { %p12_p12 = scmp.ge.s32.totalorder %s15_s16, 10   ;;  %s731_s10 = smov %s518_s11 }
 0x20d   : > { %s732_s11 = smov %s626_s29  ;;  %s733_s12 = smov %s530_s14 }
 0x20e   : > { %s734_s13 = smov %s534_s15  ;;  %s735_s14 = smov %s738_s18 }
 0x20f   : > { %s736_s15 = smov %s742_s19  ;;  %14 = sbr.rel (!%p12_p12) target bundleno = 5 (0x5), region = 79 }
 0x216   :  { %273 = vsyncpa [#allocation6], 1 }
 0x217   :  { %275 = vsyncpa [#allocation6 + $0x1], 1 }

</bundles_post_ra>
